<compile_context>
chip_gen: v7x
topology: tpu7x:2x2x1
jax: 0.10.0
libtpu: 0.0.40
codegen_flags: <defaults>
</compile_context>

<pallas_src>
import functools

import jax
import jax.numpy as jnp
from jax.experimental import pallas as pl
from jax.experimental.pallas import tpu as pltpu


def _round_up(v, m):
    return ((v + m - 1) // m) * m


def _round_down(v, m):
    return max(m, (v // m) * m)


def _cb_intervene_kernel(x_ref, w_ref, b_ref, c_true_ref, mask_ref,
                         c_pred_ref, c_int_ref, *, matmul_in_bf16):
    xv = x_ref[...]
    wv = w_ref[...]
    if matmul_in_bf16:
        xv = xv.astype(jnp.bfloat16)
        wv = wv.astype(jnp.bfloat16)
    # c_logit = x @ W + b  (MXU matmul, f32 accumulation)
    logit = jnp.dot(xv, wv, preferred_element_type=jnp.float32)
    logit = logit + b_ref[...].astype(jnp.float32)
    # activation -> EUP
    c_pred = jax.nn.sigmoid(logit)
    # intervention: replace predicted concepts with ground truth where mask set
    c_int = jnp.where(mask_ref[...] != 0,
                      c_true_ref[...].astype(jnp.float32), c_pred)
    c_pred_ref[...] = c_pred.astype(c_pred_ref.dtype)
    c_int_ref[...] = c_int.astype(c_int_ref.dtype)


def _cb_plain_kernel(x_ref, w_ref, b_ref, c_pred_ref, *, matmul_in_bf16):
    xv = x_ref[...]
    wv = w_ref[...]
    if matmul_in_bf16:
        xv = xv.astype(jnp.bfloat16)
        wv = wv.astype(jnp.bfloat16)
    logit = jnp.dot(xv, wv, preferred_element_type=jnp.float32)
    logit = logit + b_ref[...].astype(jnp.float32)
    c_pred_ref[...] = jax.nn.sigmoid(logit).astype(c_pred_ref.dtype)


def _tile_sizes(B, F, C, block_b, block_c, in_itemsize, ct_itemsize,
                mask_itemsize, out_itemsize):
    """Pick (batch_tile, concept_tile, vmem_limit_bytes)."""
    # Concept (lane) tile: full-dim block for small C (legal for any size and
    # avoids padding the B x C streams); otherwise a 128/256-lane multiple.
    if C <= block_c:
        bc = C
    else:
        bc = _round_down(block_c, 128)
        if bc >= 256:
            bc = _round_down(bc, 256)   # fill the 256-wide MXU N on v6e/v7x

    # Batch (sublane) tile.
    bb = max(8, _round_down(min(int(block_b), _round_up(B, 8)), 8))
    if B > 8:
        # Keep >= 2 batch tiles so the "parallel" batch axis can span both
        # TensorCores on v7x.
        bb = min(bb, _round_up((B + 1) // 2, 8))

    def footprint(bb_, bc_):
        per_step = (bb_ * F * in_itemsize          # x tile
                    + F * bc_ * in_itemsize        # W tile
                    + bc_ * in_itemsize            # bias tile
                    + bb_ * bc_ * ct_itemsize      # c_true tile
                    + bb_ * bc_ * mask_itemsize    # mask tile
                    + 2 * bb_ * bc_ * out_itemsize)  # c_pred + c_int tiles
        return 2 * per_step                        # double-buffered pipeline

    budget = 40 * 1024 * 1024   # leaves headroom on v7x's 64 MiB VMEM
    while footprint(bb, bc) > budget and bb > 8:
        bb = max(8, _round_down(bb // 2, 8))
    while footprint(bb, bc) > budget and bc > 128:
        bc = _round_down(bc // 2, 128)

    vmem_limit = min(footprint(bb, bc) + (8 << 20), 100 << 20)
    vmem_limit = max(vmem_limit, 16 << 20)
    return bb, bc, vmem_limit


@functools.partial(jax.jit,
                   static_argnames=("block_b", "block_c", "matmul_in_bf16",
                                    "out_dtype"))
def concept_bottleneck_forward(x, w, b, c_true=None, intervention_idxs=None,
                               *, block_b=512, block_c=512,
                               matmul_in_bf16=False, out_dtype=jnp.float32):
    """Pallas implementation of ConceptBottleneck.forward.

    Args:
      x: [B, F] inputs.
      w: [F, C] ConceptEncoder (nn.Linear) weight, already transposed.
      b: [C] or [1, C] bias.
      c_true: optional [B, C] ground-truth concepts.
      intervention_idxs: optional [B, C] mask (nonzero/True => use c_true).
        Passed in the caller's dtype; compared against 0 inside the kernel.
      block_b: target batch tile (rows per grid step), multiple of 8.
      block_c: target concept tile (lanes per grid step).
      matmul_in_bf16: cast x/W to bf16 for the MXU (f32 accumulation).
        Recommended on v6e/v7x when ~1e-2 logit error is acceptable.
      out_dtype: dtype of c_pred / c_int (bf16 halves output HBM traffic).
    Returns:
      dict with 'next', 'c_pred', 'c_int', 'emb' (emb is None).
    """
    B, F = x.shape
    C = w.shape[1]
    b2 = b.reshape(1, C)

    do_intervene = (c_true is not None) and (intervention_idxs is not None)

    in_itemsize = jnp.dtype(x.dtype).itemsize
    ct_itemsize = jnp.dtype(c_true.dtype).itemsize if do_intervene else 4
    mask_itemsize = (jnp.dtype(intervention_idxs.dtype).itemsize
                     if do_intervene else 1)
    out_itemsize = jnp.dtype(out_dtype).itemsize

    bb, bc, vmem_limit = _tile_sizes(B, F, C, block_b, block_c, in_itemsize,
                                     ct_itemsize, mask_itemsize, out_itemsize)
    grid = (pl.cdiv(B, bb), pl.cdiv(C, bc))

    x_spec = pl.BlockSpec((bb, F), lambda i, j: (i, 0))
    w_spec = pl.BlockSpec((F, bc), lambda i, j: (0, j))
    b_spec = pl.BlockSpec((1, bc), lambda i, j: (0, j))
    bc_spec = pl.BlockSpec((bb, bc), lambda i, j: (i, j))

    compiler_params = pltpu.CompilerParams(
        dimension_semantics=("parallel", "parallel"),
        vmem_limit_bytes=int(vmem_limit))

    # x block index is constant across j (inner axis) -> DMA'd once per i.
    wb_bytes = (w.size + b2.size) * jnp.dtype(w.dtype).itemsize * grid[0]

    if do_intervene:
        bytes_accessed = int(x.size * in_itemsize + wb_bytes
                             + c_true.size * ct_itemsize
                             + intervention_idxs.size * mask_itemsize
                             + 2 * B * C * out_itemsize)
        cost = pl.CostEstimate(flops=2 * B * F * C, transcendentals=B * C,
                               bytes_accessed=bytes_accessed)
        kernel = functools.partial(_cb_intervene_kernel,
                                   matmul_in_bf16=matmul_in_bf16)
        c_pred, c_int = pl.pallas_call(
            kernel,
            out_shape=(jax.ShapeDtypeStruct((B, C), out_dtype),
                       jax.ShapeDtypeStruct((B, C), out_dtype)),
            grid_spec=pltpu.PrefetchScalarGridSpec(
                num_scalar_prefetch=0,
                grid=grid,
                in_specs=[x_spec, w_spec, b_spec, bc_spec, bc_spec],
                out_specs=[bc_spec, bc_spec]),
            compiler_params=compiler_params,
            cost_estimate=cost,
        )(x, w, b2, c_true, intervention_idxs)
    else:
        bytes_accessed = int(x.size * in_itemsize + wb_bytes
                             + B * C * out_itemsize)
        cost = pl.CostEstimate(flops=2 * B * F * C, transcendentals=B * C,
                               bytes_accessed=bytes_accessed)
        kernel = functools.partial(_cb_plain_kernel,
                                   matmul_in_bf16=matmul_in_bf16)
        c_pred = pl.pallas_call(
            kernel,
            out_shape=jax.ShapeDtypeStruct((B, C), out_dtype),
            grid_spec=pltpu.PrefetchScalarGridSpec(
                num_scalar_prefetch=0,
                grid=grid,
                in_specs=[x_spec, w_spec, b_spec],
                out_specs=bc_spec),
            compiler_params=compiler_params,
            cost_estimate=cost,
        )(x, w, b2)
        c_int = c_pred   # intervene(c_pred, None, None) == c_pred

    # 'next' passed to the next layer is the intervened concept tensor.
    return {"next": c_int, "c_pred": c_pred, "c_int": c_int, "emb": None}


if __name__ == "__main__":
    key = jax.random.PRNGKey(0)
    B, F, C = 8, 32, 16  # batch, in_features, n_concepts

    k_x, k_w, k_b, k_ct, k_m = jax.random.split(key, 5)
    x = jax.random.normal(k_x, (B, F), dtype=jnp.float32)
    # Deterministic "Linear" parameters (ConceptEncoder(in_features=F, {1: C})).
    w = jax.random.normal(k_w, (F, C), dtype=jnp.float32) * (1.0 / jnp.sqrt(F))
    b = jax.random.normal(k_b, (C,), dtype=jnp.float32) * 0.01
    c_true = jax.random.bernoulli(k_ct, 0.5, (B, C)).astype(jnp.float32)
    # Mask stays in the caller's dtype (f32 here); the kernel does the `!= 0`.
    mask = jax.random.bernoulli(k_m, 0.3, (B, C)).astype(jnp.float32)

    out = concept_bottleneck_forward(x, w, b, c_true, mask)
    jax.block_until_ready((out["c_pred"], out["c_int"]))

    # Reference check in plain JAX (f32 matmul path, tight tolerance).
    c_pred_ref = jax.nn.sigmoid(x @ w + b[None, :])
    c_int_ref = jnp.where(mask > 0, c_true, c_pred_ref)
    assert jnp.allclose(out["c_pred"], c_pred_ref, atol=1e-5, rtol=1e-5)
    assert jnp.allclose(out["c_int"], c_int_ref, atol=1e-5, rtol=1e-5)
    assert out["next"].shape == (B, C)
    assert out["emb"] is None

    # Non-tile-divisible batch, int8 mask at rest, bf16 MXU operands
    # (v6e/v7x-recommended path).  Exercises multi-tile batch grid + edge
    # masking without any wrapper pads/slices.
    B2 = 300
    k2x, k2c, k2m = jax.random.split(jax.random.PRNGKey(1), 3)
    x2 = jax.random.normal(k2x, (B2, F), dtype=jnp.float32)
    c_true2 = jax.random.bernoulli(k2c, 0.5, (B2, C)).astype(jnp.float32)
    mask2 = jax.random.bernoulli(k2m, 0.3, (B2, C)).astype(jnp.int8)
    out2 = concept_bottleneck_forward(x2, w, b, c_true2, mask2,
                                      matmul_in_bf16=True)
    jax.block_until_ready(out2["c_int"])
    c_pred_ref2 = jax.nn.sigmoid(x2 @ w + b[None, :])
    c_int_ref2 = jnp.where(mask2 != 0, c_true2, c_pred_ref2)
    assert jnp.allclose(out2["c_pred"], c_pred_ref2, atol=1e-2)
    assert jnp.allclose(out2["c_int"], c_int_ref2, atol=1e-2)

    # No-intervention path (c_true / intervention_idxs omitted).
    out3 = concept_bottleneck_forward(x, w, b)
    jax.block_until_ready(out3["c_pred"])
    assert jnp.allclose(out3["c_pred"], c_pred_ref, atol=1e-5, rtol=1e-5)
    assert jnp.allclose(out3["c_int"], c_pred_ref, atol=1e-5, rtol=1e-5)

    print("KERNEL_OK")
</pallas_src>

<mosaic_0001>
module attributes {stable_mosaic.version = 11 : i64} {
  func.func @_cb_intervene_kernel(%arg0: i32, %arg1: i32, %arg2: memref<8x32xf32, #tpu.memory_space<vmem>>, %arg3: memref<32x16xf32, #tpu.memory_space<vmem>>, %arg4: memref<1x16xf32, #tpu.memory_space<vmem>>, %arg5: memref<8x16xf32, #tpu.memory_space<vmem>>, %arg6: memref<8x16xf32, #tpu.memory_space<vmem>>, %arg7: memref<8x16xf32, #tpu.memory_space<vmem>>, %arg8: memref<8x16xf32, #tpu.memory_space<vmem>>) attributes {dimension_semantics = [#tpu.dimension_semantics<parallel>, #tpu.dimension_semantics<parallel>], iteration_bounds = array<i64: 1, 1>, scalar_prefetch = 0 : i64, scratch_operands = 0 : i64, tpu.core_type = #tpu.core_type<tc>, window_params = [{transform_indices = @transform_0, window_bounds = array<i64: 8, 32>}, {transform_indices = @transform_1, window_bounds = array<i64: 32, 16>}, {transform_indices = @transform_2, window_bounds = array<i64: 1, 16>}, {transform_indices = @transform_3, window_bounds = array<i64: 8, 16>}, {transform_indices = @transform_4, window_bounds = array<i64: 8, 16>}, {transform_indices = @transform_5, window_bounds = array<i64: 8, 16>}, {transform_indices = @transform_6, window_bounds = array<i64: 8, 16>}]} {
    %c0 = arith.constant 0 : index
    %c0_0 = arith.constant 0 : index
    %0 = vector.load %arg2[%c0, %c0_0] : memref<8x32xf32, #tpu.memory_space<vmem>>, vector<8x32xf32>
    %c0_1 = arith.constant 0 : index
    %c0_2 = arith.constant 0 : index
    %1 = vector.load %arg3[%c0_1, %c0_2] : memref<32x16xf32, #tpu.memory_space<vmem>>, vector<32x16xf32>
    %cst = arith.constant dense<0.000000e+00> : vector<8x16xf32>
    %2 = tpu.matmul %0, %1, %cst {dimension_numbers = #tpu.dot_dimension_numbers<[1], [0], [0], [1], [0, 0, 1, 1], [], []>} : vector<8x32xf32>, vector<32x16xf32>, vector<8x16xf32> -> vector<8x16xf32>
    %c0_3 = arith.constant 0 : index
    %c0_4 = arith.constant 0 : index
    %3 = vector.load %arg4[%c0_3, %c0_4] : memref<1x16xf32, #tpu.memory_space<vmem>>, vector<1x16xf32>
    %4 = vector.broadcast %3 : vector<1x16xf32> to vector<8x16xf32>
    %5 = arith.addf %2, %4 : vector<8x16xf32>
    %6 = arith.negf %5 : vector<8x16xf32>
    %7 = math.exp %6 : vector<8x16xf32>
    %cst_5 = arith.constant 1.000000e+00 : f32
    %8 = vector.broadcast %cst_5 : f32 to vector<8x16xf32>
    %9 = arith.addf %8, %7 : vector<8x16xf32>
    %10 = arith.divf %8, %9 : vector<8x16xf32>
    %c0_6 = arith.constant 0 : index
    %c0_7 = arith.constant 0 : index
    %11 = vector.load %arg6[%c0_6, %c0_7] : memref<8x16xf32, #tpu.memory_space<vmem>>, vector<8x16xf32>
    %cst_8 = arith.constant 0.000000e+00 : f32
    %12 = vector.broadcast %cst_8 : f32 to vector<8x16xf32>
    %13 = arith.cmpf one, %11, %12 : vector<8x16xf32>
    %c0_9 = arith.constant 0 : index
    %c0_10 = arith.constant 0 : index
    %14 = vector.load %arg5[%c0_9, %c0_10] : memref<8x16xf32, #tpu.memory_space<vmem>>, vector<8x16xf32>
    %15 = arith.select %13, %14, %10 : vector<8x16xi1>, vector<8x16xf32>
    %c0_11 = arith.constant 0 : index
    %c0_12 = arith.constant 0 : index
    %16 = vector.load %arg7[%c0_11, %c0_12] : memref<8x16xf32, #tpu.memory_space<vmem>>, vector<8x16xf32>
    tpu.vector_store %arg7[%c0_11, %c0_12], %10 {strides = array<i32>} : memref<8x16xf32, #tpu.memory_space<vmem>>, vector<8x16xf32>,
    %c0_13 = arith.constant 0 : index
    %c0_14 = arith.constant 0 : index
    %17 = vector.load %arg8[%c0_13, %c0_14] : memref<8x16xf32, #tpu.memory_space<vmem>>, vector<8x16xf32>
    tpu.vector_store %arg8[%c0_13, %c0_14], %15 {strides = array<i32>} : memref<8x16xf32, #tpu.memory_space<vmem>>, vector<8x16xf32>,
    return
  }
  func.func @transform_0(%arg0: i32, %arg1: i32) -> (i32, i32) {
    %c0_i32 = arith.constant 0 : i32
    %c0_i32_0 = arith.constant 0 : i32
    return %arg0, %c0_i32 : i32, i32
  }
  func.func @transform_1(%arg0: i32, %arg1: i32) -> (i32, i32) {
    %c0_i32 = arith.constant 0 : i32
    %c0_i32_0 = arith.constant 0 : i32
    return %c0_i32, %arg1 : i32, i32
  }
  func.func @transform_2(%arg0: i32, %arg1: i32) -> (i32, i32) {
    %c0_i32 = arith.constant 0 : i32
    %c0_i32_0 = arith.constant 0 : i32
    return %c0_i32, %arg1 : i32, i32
  }
  func.func @transform_3(%arg0: i32, %arg1: i32) -> (i32, i32) {
    %c0_i32 = arith.constant 0 : i32
    return %arg0, %arg1 : i32, i32
  }
  func.func @transform_4(%arg0: i32, %arg1: i32) -> (i32, i32) {
    %c0_i32 = arith.constant 0 : i32
    return %arg0, %arg1 : i32, i32
  }
  func.func @transform_5(%arg0: i32, %arg1: i32) -> (i32, i32) {
    %c0_i32 = arith.constant 0 : i32
    return %arg0, %arg1 : i32, i32
  }
  func.func @transform_6(%arg0: i32, %arg1: i32) -> (i32, i32) {
    %c0_i32 = arith.constant 0 : i32
    return %arg0, %arg1 : i32, i32
  }
}

</mosaic_0001>

<bundles_post_ra>
// kernel: concept_bottleneck_forward.1
= control target key start
LH: loop header
LB: loop body
LE: loop exit
PB: predicated region body
PF: predicated region fallthrough
CT: control target
= control target key end

     0   :  { %v197_v3 = vmov 0.0|0.0   ;;  %vm198_vm0 = vmmov 0   ;;  %v199_v6 = vmov 0.0   ;;  %s275_s0 = inlined_call_operand.vmem [shape: f32[8,32], index: 0, kind: input, shape index: {}]   ;;  %s276_s1 = inlined_call_operand.vmem [shape: f32[32,16], index: 1, kind: input, shape index: {}]   ;;  %s277_s2 = inlined_call_operand.vmem [shape: f32[1,16], index: 2, kind: input, shape index: {}]   ;;  %s278_s3 = inlined_call_operand.vmem [shape: f32[8,16], index: 3, kind: input, shape index: {}]   ;;  %s279_s4 = inlined_call_operand.vmem [shape: f32[8,16], index: 4, kind: input, shape index: {}]   ;;  %s280_s5 = inlined_call_operand.hbm [shape: f32[8,16], index: 5, kind: output, shape index: {0}]   ;;  %s281_s6 = inlined_call_operand.vmem [shape: f32[8,16], index: 6, kind: output, shape index: {1}]  }
   0x1   :  { %v24_v0 = vld [vmem:[%s276_s1] sm:$0xff]  ;;  %v25_v1 = vld [vmem:[%s276_s1 + $0x8] sm:$0xff]  ;;  %v26_v2 = vld [vmem:[%s276_s1 + $0x10] sm:$0xff]  ;;  %159 = vmatprep.subr.bf16.mxu0 %v197_v3  ;;  %156 = vmatprep.mubr.msk.f32.mxu0 %vm198_vm0, %v199_v6 }
   0x2   :  { %v160_v4 = vpack.c.bf16 %v25_v1, %v24_v0  ;;  %v27_v5 = vld [vmem:[%s276_s1 + $0x18] sm:$0xff] }
   0x3   :  { %12 = vsyncpa [#allocation3], 0  ;;  %v163_v7 = vpack.c.bf16 %v27_v5, %v26_v2  ;;  %v23_v8 = vld [vmem:[%s275_s0] sm:$0xff]  ;;  %vm35_vm1 = vcmask 261120   ;;  %s200_s10 = smov [#allocation2]   ;;  %vm119_vm3 = vcmask 130048  }
   0x4   :  { %161 = vmatpush3.bf16.msra.mxu0 %v160_v4  ;;  %v140_v9 = vld [vmem:[%s277_s2] ss:$0 sm:$0xff]  ;;  %s128_s0 = sshll.u32 %s200_s10, 4  ;;  %s129_s0 = int_to_ptr.vmem [resolvable:$true] %s128_s0 }
   0x5   :  { %162 = vmatprep.subr.bf16.mxu0 %v197_v3  ;;  %v115_v16 = vld [vmem:[%s279_s4] sm:$0xff]  ;;  %s173_s14 = scalar_lea.vmem %s129_s0, 128  ;;  %p178_p1 = scmp.lt.s32.totalorder %s129_s0, %s129_s0 }
   0x6   :  { %vm116_vm2 = vcmp.ne.f32.partialorder %v115_v16, 0.0  ;;  %v117_v17 = vld [vmem:[%s278_s3] sm:$0xff]  ;;  %p174_p0 = scmp.ne.s32.totalorder %s129_s0, %s173_s14  ;;  %p179_p2 = scmp.lt.s32.totalorder %s173_s14, %s173_s14 }
   0x8   :  { %164 = vmatpush3.bf16.msra.mxu0 %v163_v7  ;;  %p180_p3 = por %p179_p2, %p178_p1 }
   0xa   :  { %p181_p4 = pnand %p180_p3, %p174_p0 }
   0xb   :  { %157 = vmatmul.mubr.msk.f32.vlgmr.msra.gmra.mrb[0].mxu0 %vm35_vm1, %v23_v8 }
  0xde   :  { %v105_v10 = vpop.f32.mrb[0].mxu0 }
  0xdf   :  { %v106_v11 = vadd.f32 %v140_v9, %v105_v10  ;;  %v158_v12 = vpop.f32.mrb[1].mxu0 }
  0xe1   :  { %v142_v13 = vmul.f32 -1.442695, %v106_v11 }
  0xe3   :  { %169 = vpow2.f32 %v142_v13 }
  0xed   :  { %v170_v14 = vpop.eup %169 }
  0xee   :  { %v112_v15 = vadd.f32 1.0, %v170_v14 }
  0xf0   :  { %171 = vrcp.f32 %v112_v15 }
  0xfa   :  { %v172_v18 = vpop.eup %171 }
  0xfb   :  { %v118_v19 = vsel %vm116_vm2, %v117_v17, %v172_v18  ;;  %120 = vst.msk [vmem:[#allocation2] sm:$0xff] %vm119_vm3, %v172_v18 }
  0xfc   :  { %121 = vst.msk [vmem:[%s281_s6] sm:$0xff] %vm119_vm3, %v118_v19 }
  0xfd   :  { %184 = shalt.err (!%p181_p4)
}
  0xfe   :  { %s185_s3 = scalar_lea.hbm %s280_s5, 128 }
  0xff   :  { %p186_p5 = scmp.ne.s32.totalorder %s280_s5, %s185_s3  ;;  %p189_p6 = scmp.lt.u32.totalorder %s185_s3, %s280_s5 }
 0x101   :  { %p191_p7 = pnand %p189_p6, %p186_p5 }
 0x103   :  { %194 = shalt.err (!%p191_p7)
}
 0x104   :  { %131 = dma.vmem_to_hbm [thread:$0]  %s129_s0, 128, %s280_s5, [#allocation3]  }
 0x105   :  { %195 = dma.done.wait [#allocation3], 128  }
 0x106   :  { %196 = vsyncadd [#allocation3], 4294967168 }
 0x107   :  { %139 = vsyncpa [#allocation3], 1 }

</bundles_post_ra>
